<compile_context>
chip_gen: v5e
topology: v5e:2x2
jax: 0.10.0
libtpu: 0.0.40
codegen_flags: <defaults>
</compile_context>

<pallas_src>
import math

import jax
import jax.numpy as jnp
from jax.experimental import pallas as pl
from jax.experimental.pallas import tpu as pltpu

KERNEL = 6
STRIDE = 3


def _round_up(n, m):
    return ((n + m - 1) // m) * m


# ----------------------------- Pallas kernels ------------------------------
def _linear_kernel(x_ref, wt_ref, b_ref, o_ref):
    # x: (N, Din), wt: (Din, Dout) pre-transposed, b: (1, Dout)
    o_ref[...] = (
        jnp.dot(x_ref[...], wt_ref[...], preferred_element_type=jnp.float32)
        + b_ref[...]
    ).astype(o_ref.dtype)


def _make_fused_kernel(op, *, channels, c_pad, l_out):
    """Fused conv(+linear) kernels.

    common refs:
      x_ref   : (C, dim_in)        team column + raw positions
      sel_ref : (Lin, K*Lout)      0/1 im2col selection matrix
      w2_ref  : (C, K*C_pad)       combined conv weight (zero-padded columns)
      cb_ref  : (C, 1)             conv bias
    'conv+linear' / 'conv->linear' additionally:
      wt_ref  : (Din_lin, dim_h)   pre-transposed linear weight
      lb_ref  : (1, dim_h)         linear bias
    scratch:
      patches_ref : (K*C_pad, Lout) contraction-major im2col buffer
    """
    half_rows = (KERNEL // 2) * c_pad

    def _conv_local(xv, sel, w2, cb, patches_ref):
        # Zero the scratch once so the padded rows (multiplied by zero weight
        # columns) can never inject non-finite garbage.
        patches_ref[...] = jnp.zeros_like(patches_ref)
        raw = xv[:, 1:]                                               # (C, Lin)
        # im2col via one tiny GEMM ...
        z = jnp.dot(raw, sel, preferred_element_type=jnp.float32)    # (C, K*Lout)
        # ... re-emitted in (K*C_pad, Lout) layout with aligned slice-stores.
        for k in range(KERNEL):
            patches_ref[k * c_pad:k * c_pad + channels, :] = (
                z[:, k * l_out:(k + 1) * l_out]
            )
        p = patches_ref[...]                                          # (K*C_pad, Lout)
        # Two *independent* <=96-deep GEMMs instead of 6 chained small dots.
        local = (
            jnp.dot(w2[:, :half_rows], p[:half_rows, :],
                    preferred_element_type=jnp.float32)
            + jnp.dot(w2[:, half_rows:], p[half_rows:, :],
                      preferred_element_type=jnp.float32)
        )
        return local + cb                                             # (C, Lout)

    if op == "conv":
        def kernel(x_ref, sel_ref, w2_ref, cb_ref, o_ref, patches_ref):
            xv = x_ref[...]
            local = _conv_local(xv, sel_ref[...], w2_ref[...], cb_ref[...],
                                patches_ref)
            # slice-stores instead of lane-axis concatenate
            o_ref[:, 0:1] = xv[:, 0:1].astype(o_ref.dtype)
            o_ref[:, 1:1 + l_out] = local.astype(o_ref.dtype)
        return kernel

    if op == "conv+linear":
        def kernel(x_ref, sel_ref, w2_ref, cb_ref, wt_ref, lb_ref, o_ref,
                   patches_ref):
            xv = x_ref[...]
            local = _conv_local(xv, sel_ref[...], w2_ref[...], cb_ref[...],
                                patches_ref)
            glob = (
                jnp.dot(xv[:, 1:], wt_ref[...],
                        preferred_element_type=jnp.float32)
                + lb_ref[...]
            )
            o_ref[:, 0:1] = xv[:, 0:1].astype(o_ref.dtype)
            o_ref[:, 1:1 + l_out] = local.astype(o_ref.dtype)
            o_ref[:, 1 + l_out:] = glob.astype(o_ref.dtype)
        return kernel

    if op == "conv->linear":
        def kernel(x_ref, sel_ref, w2_ref, cb_ref, wt_ref, lb_ref, o_ref,
                   patches_ref):
            xv = x_ref[...]
            local = _conv_local(xv, sel_ref[...], w2_ref[...], cb_ref[...],
                                patches_ref)
            # concat kept here: it feeds the GEMM directly.
            h = jnp.concatenate([xv[:, 0:1], local], axis=-1)         # (C, Lout+1)
            o_ref[...] = (
                jnp.dot(h, wt_ref[...], preferred_element_type=jnp.float32)
                + lb_ref[...]
            ).astype(o_ref.dtype)
        return kernel

    raise ValueError(op)


_VMEM_SPEC = pl.BlockSpec(memory_space=pltpu.MemorySpace.VMEM)


# ------------------------------- module port -------------------------------
class InputLayer:
    """JAX/Pallas port of the PyTorch InputLayer (fused single-kernel forward)."""

    def __init__(self, dim_in, dim_h, op, batch_size, key):
        self.op = op
        self.dim_in = dim_in
        kernel, stride = KERNEL, STRIDE
        channels = batch_size * (7 + 7 + 1)
        self.channels = channels

        keys = jax.random.split(key, 4)

        def _uniform(k, shape, fan_in):
            bound = 1.0 / (fan_in ** 0.5)
            return jax.random.uniform(k, shape, jnp.float32, -bound, bound)

        # original-layout params (kept for the reference check)
        self.conv_w = None
        self.conv_b = None
        self.lin_w = None
        self.lin_b = None

        # actual conv geometry on raw_pos = x[:, 1:]
        l_in = dim_in - 1
        l_out = (l_in - kernel) // stride + 1
        self.l_out = l_out

        if op == "linear":
            self.lin_w = _uniform(keys[0], (dim_h, dim_in), dim_in)
            self.lin_b = _uniform(keys[1], (dim_h,), dim_in)
            self.out_size = dim_h
        elif op == "raw":
            self.out_size = dim_in
        elif op in ("conv", "conv+linear", "conv->linear"):
            assert l_out >= 1, "dim_in too small for kernel=6/stride=3 conv"
            fan = channels * kernel
            self.conv_w = _uniform(keys[0], (channels, channels, kernel), fan)
            self.conv_b = _uniform(keys[1], (channels,), fan)
            if op == "conv":
                self.out_size = l_out + 1
            elif op == "conv+linear":
                self.lin_w = _uniform(keys[2], (dim_h, dim_in - 1), dim_in - 1)
                self.lin_b = _uniform(keys[3], (dim_h,), dim_in - 1)
                self.out_size = l_out + dim_h + 1
            else:  # conv->linear
                lin_in = l_out + 1
                self.lin_w = _uniform(keys[2], (dim_h, lin_in), lin_in)
                self.lin_b = _uniform(keys[3], (dim_h,), lin_in)
                self.out_size = dim_h
        else:
            raise ValueError(op)

        # ------------- kernel-ready layouts + prebuilt jitted forward -------
        self._params = ()
        self._fwd = None

        if op == "raw":
            self._fwd = lambda x: x
            return

        lin_wt = lin_b2d = None
        if self.lin_w is not None:
            lin_wt = jnp.asarray(self.lin_w.T)                 # (Din, Dout)
            lin_b2d = self.lin_b.reshape(1, -1)                # (1, Dout)

        if op == "linear":
            self._params = (lin_wt, lin_b2d)

            def fwd(x, wt, b):
                n, din = x.shape
                dout = wt.shape[1]
                cost = pl.CostEstimate(
                    flops=2 * n * din * dout,
                    transcendentals=0,
                    bytes_accessed=4 * (n * din + din * dout + dout + n * dout),
                )
                return pl.pallas_call(
                    _linear_kernel,
                    out_shape=jax.ShapeDtypeStruct((n, dout), jnp.float32),
                    in_specs=[_VMEM_SPEC] * 3,
                    out_specs=_VMEM_SPEC,
                    cost_estimate=cost,
                )(x, wt, b)

            self._fwd = jax.jit(fwd)
            return

        # conv-flavoured ops ------------------------------------------------
        c_pad = _round_up(channels, 8)                         # sublane-friendly
        self._c_pad = c_pad

        # combined conv weight: w2[co, k*c_pad + ci] = conv_w[co, ci, k]
        w2 = jnp.zeros((channels, kernel * c_pad), jnp.float32)
        for k in range(kernel):
            w2 = w2.at[:, k * c_pad:k * c_pad + channels].set(self.conv_w[:, :, k])
        conv_b2d = self.conv_b.reshape(channels, 1)

        # im2col selection: sel[l, k*l_out + j] = 1 iff l == j*stride + k
        l_idx = jnp.arange(l_in)[:, None]
        m_idx = jnp.arange(kernel * l_out)[None, :]
        k_idx = m_idx // l_out
        j_idx = m_idx % l_out
        sel = (l_idx == j_idx * stride + k_idx).astype(jnp.float32)

        kern = _make_fused_kernel(op, channels=channels, c_pad=c_pad, l_out=l_out)

        if op == "conv":
            self._params = (sel, w2, conv_b2d)
            out_cols = l_out + 1
            extra_flops = 0
        elif op == "conv+linear":
            self._params = (sel, w2, conv_b2d, lin_wt, lin_b2d)
            out_cols = l_out + dim_h + 1
            extra_flops = 2 * channels * l_in * dim_h
        else:  # conv->linear
            self._params = (sel, w2, conv_b2d, lin_wt, lin_b2d)
            out_cols = dim_h
            extra_flops = 2 * channels * (l_out + 1) * dim_h

        conv_flops = (2 * channels * l_in * kernel * l_out        # SEL im2col GEMM
                      + 2 * channels * kernel * c_pad * l_out)    # conv GEMMs
        flops = conv_flops + extra_flops
        param_elems = sum(math.prod(p.shape) for p in self._params)
        bytes_acc = 4 * (channels * dim_in + param_elems
                         + channels * out_cols + kernel * c_pad * l_out)
        cost = pl.CostEstimate(flops=flops, transcendentals=0,
                               bytes_accessed=bytes_acc)
        n_in = 1 + len(self._params)
        out_shape = jax.ShapeDtypeStruct((channels, out_cols), jnp.float32)
        scratch = [pltpu.VMEM((kernel * c_pad, l_out), jnp.float32)]

        def fwd(x, *ps):
            return pl.pallas_call(
                kern,
                out_shape=out_shape,
                in_specs=[_VMEM_SPEC] * n_in,
                out_specs=_VMEM_SPEC,
                scratch_shapes=scratch,
                cost_estimate=cost,
            )(x, *ps)

        self._fwd = jax.jit(fwd)

    def get_output_size(self):
        return self.out_size

    def __call__(self, x):
        if self.op == "raw":
            return x
        return self._fwd(x, *self._params)


# --------------------------- reference (plain JAX) --------------------------
def _ref_conv1d(raw_pos, w, b):
    out = jax.lax.conv_general_dilated(
        raw_pos[None],              # (1, C, L)
        w,                          # (O, I, K)
        window_strides=(STRIDE,),
        padding="VALID",
        dimension_numbers=("NCH", "OIH", "NCH"),
    )[0]
    return out + b[:, None]


def _ref_forward(layer, x):
    if layer.op == "linear":
        return x @ layer.lin_w.T + layer.lin_b
    if layer.op == "raw":
        return x
    raw_pos = x[:, 1:]
    team = x[:, 0][:, None]
    local = _ref_conv1d(raw_pos, layer.conv_w, layer.conv_b)
    if layer.op == "conv":
        return jnp.concatenate([team, local], axis=-1)
    if layer.op == "conv+linear":
        glob = raw_pos @ layer.lin_w.T + layer.lin_b
        return jnp.concatenate([team, local, glob], axis=-1)
    if layer.op == "conv->linear":
        out = jnp.concatenate([team, local], axis=-1)
        return out @ layer.lin_w.T + layer.lin_b
    raise ValueError(layer.op)


# ---------------------------------- main ------------------------------------
if __name__ == "__main__":
    dim_in, dim_h, batch_size = 16, 32, 2
    channels = batch_size * (7 + 7 + 1)        # 30

    root = jax.random.PRNGKey(0)
    kx, kp = jax.random.split(root)
    x = jax.random.normal(kx, (channels, dim_in), dtype=jnp.float32)

    ok = True
    for op in ("linear", "raw", "conv", "conv+linear", "conv->linear"):
        layer = InputLayer(dim_in, dim_h, op, batch_size, kp)
        out = jax.block_until_ready(layer(x))
        ref = _ref_forward(layer, x)
        if out.shape != ref.shape or not bool(
            jnp.allclose(out, ref, atol=1e-4, rtol=1e-4)
        ):
            ok = False
            break

    if ok:
        print("KERNEL_OK")
</pallas_src>

<mosaic_0001>
module attributes {stable_mosaic.version = 11 : i64} {
  func.func @_linear_kernel(%arg0: memref<30x16xf32, #tpu.memory_space<vmem>>, %arg1: memref<16x32xf32, #tpu.memory_space<vmem>>, %arg2: memref<1x32xf32, #tpu.memory_space<vmem>>, %arg3: memref<30x32xf32, #tpu.memory_space<vmem>>) attributes {dimension_semantics = [], scalar_prefetch = 0 : i64, scratch_operands = 0 : i64, tpu.core_type = #tpu.core_type<tc>} {
    %c0 = arith.constant 0 : index
    %c0_0 = arith.constant 0 : index
    %0 = vector.load %arg0[%c0, %c0_0] : memref<30x16xf32, #tpu.memory_space<vmem>>, vector<30x16xf32>
    %c0_1 = arith.constant 0 : index
    %c0_2 = arith.constant 0 : index
    %1 = vector.load %arg1[%c0_1, %c0_2] : memref<16x32xf32, #tpu.memory_space<vmem>>, vector<16x32xf32>
    %cst = arith.constant dense<0.000000e+00> : vector<30x32xf32>
    %2 = tpu.matmul %0, %1, %cst {dimension_numbers = #tpu.dot_dimension_numbers<[1], [0], [0], [1], [0, 0, 1, 1], [], []>} : vector<30x16xf32>, vector<16x32xf32>, vector<30x32xf32> -> vector<30x32xf32>
    %c0_3 = arith.constant 0 : index
    %c0_4 = arith.constant 0 : index
    %3 = vector.load %arg2[%c0_3, %c0_4] : memref<1x32xf32, #tpu.memory_space<vmem>>, vector<1x32xf32>
    %4 = vector.broadcast %3 : vector<1x32xf32> to vector<30x32xf32>
    %5 = arith.addf %2, %4 : vector<30x32xf32>
    %c0_5 = arith.constant 0 : index
    %c0_6 = arith.constant 0 : index
    %6 = vector.load %arg3[%c0_5, %c0_6] : memref<30x32xf32, #tpu.memory_space<vmem>>, vector<30x32xf32>
    tpu.vector_store %arg3[%c0_5, %c0_6], %5 {strides = array<i32>} : memref<30x32xf32, #tpu.memory_space<vmem>>, vector<30x32xf32>,
    return
  }
}

</mosaic_0001>

<bundles_post_ra>
// kernel: fwd.1
= control target key start
LH: loop header
LB: loop body
LE: loop exit
PB: predicated region body
PF: predicated region fallthrough
CT: control target
= control target key end

     0   :  { %vm25_vm0 = vcmask 130048   ;;  %s181_s0 = inlined_call_operand.vmem [shape: f32[30,16], index: 0, kind: input, shape index: {}]   ;;  %s182_s1 = inlined_call_operand.vmem [shape: f32[16,32], index: 1, kind: input, shape index: {}]   ;;  %s183_s2 = inlined_call_operand.vmem [shape: f32[1,32], index: 2, kind: input, shape index: {}]   ;;  %s184_s3 = inlined_call_operand.hbm [shape: f32[30,32], index: 3, kind: output, shape index: {}]  }
   0x1   :  { %v20_v0 = vld [vmem:[%s182_s1 + $0x8] sm:$0xff]  ;;  %v19_v1 = vld [vmem:[%s182_s1] sm:$0xff]  ;;  %v17_v2 = vld [vmem:[%s181_s0 + $0x10] sm:$0xff] }
   0x2   :  { %96 = vmatpush.msra.mxu2 %v20_v0  ;;  %97 = vmatpush.msra.mxu3 %v20_v0  ;;  %v18_v3 = vld [vmem:[%s181_s0 + $0x18] sm:$0x3f] }
   0x3   :  { %52 = vmatpush.msra.mxu0 %v20_v0  ;;  %95 = vmatpush.msra.mxu1 %v20_v0 }
   0x4   :  { %8 = vsyncpa [#allocation3], 0  ;;  %99 = vmatpush.msra.mxu2 %v19_v1  ;;  %100 = vmatpush.msra.mxu3 %v19_v1  ;;  %v15_v4 = vld [vmem:[%s181_s0] sm:$0xff]  ;;  %v16_v5 = vld [vmem:[%s181_s0 + $0x8] sm:$0xff]  ;;  %vm67_vm1 = vcmask 261120   ;;  %s131_s25 = smov [#allocation2]  }
   0x5   :  { %93 = vmatmul.msk.f32.vlgmr.msra.gmra.mxu2 %vm25_vm0, %v17_v2  ;;  %94 = vmatmul.msk.f32.vlgmr.msra.gmra.mxu3 %vm25_vm0, %v18_v3  ;;  %v104_v6 = vld [vmem:[%s183_s2] ss:$0 sm:$0xff]  ;;  %s77_s26 = sshll.u32 %s131_s25, 4  ;;  %s79_s0 = sshll.u32 %s184_s3, 4  ;;  %vm71_vm2 = vcmask 259072   ;;  %s78_s26 = int_to_ptr.vmem [resolvable:$true] %s77_s26  ;;  %s80_s0 = int_to_ptr.hbm [resolvable:$true] %s79_s0 }
   0x6   :  { %53 = vmatpush.msra.mxu0 %v19_v1  ;;  %98 = vmatpush.msra.mxu1 %v19_v1  ;;  %s132_s2 = smov 128   ;;  %s133_s29 = smov 8  }
   0x7   :  { %91 = vmatmul.msk.f32.vlgmr.msra.gmra.mxu0 %vm25_vm0, %v15_v4  ;;  %92 = vmatmul.msk.f32.vlgmr.msra.gmra.mxu1 %vm25_vm0, %v16_v5 }
  0x84   :  { %v55_v7 = vpop.f32.mrf.mxu0  ;;  %v58_v8 = vpop.f32.mrf.mxu1 }
  0x85   :  { %v56_v9 = vadd.f32 %v104_v6, %v55_v7  ;;  %v59_v10 = vadd.f32 %v104_v6, %v58_v8 }
  0x87   :  { %68 = vst.msk [vmem:[#allocation2] sm:$0xff] %vm67_vm1, %v56_v9 }
  0x88   :  { %69 = vst.msk [vmem:[#allocation2 + $0x8] sm:$0xff] %vm67_vm1, %v59_v10  ;;  %v61_v11 = vpop.f32.mrf.mxu2  ;;  %v64_v12 = vpop.f32.mrf.mxu3 }
  0x89   :  { %v62_v13 = vadd.f32 %v104_v6, %v61_v11  ;;  %v65_v14 = vadd.f32 %v104_v6, %v64_v12 }
  0x8b   :  { %70 = vst.msk [vmem:[#allocation2 + $0x10] sm:$0xff] %vm67_vm1, %v62_v13 }
  0x8c   :  { %72 = vst.msk [vmem:[#allocation2 + $0x18] sm:$0x3f] %vm71_vm2, %v65_v14 }
  0x8d   :  { %85 = dma.vmem_to_hbm [thread:$0]  %s78_s26, 512, %s80_s0, [#allocation3], %s132_s2, %s132_s2, %s133_s29  }
  0x8e   :  { %129 = dma.done.wait [#allocation3], 512  }
  0x8f   :  { %130 = vsyncadd [#allocation3], 4294966784 }
  0x90   :  { %90 = vsyncpa [#allocation3], 1 }

</bundles_post_ra>
